<compile_context>
chip_gen: v5e
topology: v5e:2x2
jax: 0.10.0
libtpu: 0.0.40
codegen_flags: <defaults>
</compile_context>

<pallas_src>
import functools
import math

import jax
import jax.numpy as jnp
from jax.experimental import pallas as pl
from jax.experimental.pallas import tpu as pltpu


# ----------------------------------------------------------------------------
# Helpers
# ----------------------------------------------------------------------------
def _vmem_budget_bytes():
    """Generation-aware VMEM limit with headroom for Mosaic internal scratch."""
    try:
        cap = int(pltpu.get_tpu_info().vmem_capacity_bytes)
    except Exception:                       # info query unavailable -> be safe
        cap = 64 * 1024 * 1024              # v7x-sized conservative fallback
    return max(cap - 16 * 1024 * 1024, 32 * 1024 * 1024)


def _invariant_spec(shape):
    """BlockSpec for a grid-invariant operand (weights / biases / LN params).

    Single-buffer it when the running JAX supports pipeline_mode; default
    double-buffering of invariant blocks only wastes VMEM.
    """
    imap = lambda b, i: (0,) * len(shape)
    try:
        return pl.BlockSpec(shape, imap, pipeline_mode=pl.Buffered(1))
    except Exception:
        return pl.BlockSpec(shape, imap)


def _pick_row_tile(B, S, vmem_budget):
    """Largest row tile that divides S; 512 only when VMEM budget allows."""
    max_t = 512 if vmem_budget >= 96 * 1024 * 1024 else 256
    tq = S                                   # full-extent fallback (always legal)
    for t in (512, 256, 128, 64, 32, 16, 8):
        if t <= max_t and S % t == 0:
            tq = t
            break
    # Keep at least 2 grid steps so both v7x TensorCores get work.
    while B * (S // tq) < 2 and tq >= 16 and tq % 2 == 0 and S % (tq // 2) == 0:
        tq //= 2
    return tq


# ----------------------------------------------------------------------------
# Kernel 1: LayerNorm1 + fused Q/K/V projection, row tile of the sequence.
# Outputs are written directly in (B, H, S, hd) layout via per-head stores.
# ----------------------------------------------------------------------------
def ln1_qkv_kernel(x_ref, wqkv_ref, bqkv_ref, g1_ref, be1_ref,
                   q_ref, k_ref, v_ref, *, num_head, head_dim, eps=1e-5):
    D = num_head * head_dim
    x = x_ref[0].astype(jnp.float32)                            # (TQ, D) f32
    mu = jnp.mean(x, axis=-1, keepdims=True)
    var = jnp.mean((x - mu) ** 2, axis=-1, keepdims=True)
    y1n = ((x - mu) * jax.lax.rsqrt(var + eps) * g1_ref[...] + be1_ref[...]
           ).astype(jnp.bfloat16)                               # bf16 MXU operand

    # Single fused matmul; the 1/sqrt(hd) attention scale is pre-folded into
    # the Q columns of wqkv / bqkv by the wrapper.
    qkv = jnp.dot(y1n, wqkv_ref[...],
                  preferred_element_type=jnp.float32) + bqkv_ref[...]  # (TQ, 3D)

    # Head split via static lane slices + per-head stores (no in-register
    # transpose, no XLA split_heads round trip between the two pallas_calls).
    for h in range(num_head):
        c = h * head_dim
        q_ref[0, h] = qkv[:, c:c + head_dim].astype(jnp.bfloat16)
        k_ref[0, h] = qkv[:, D + c:D + c + head_dim].astype(jnp.bfloat16)
        v_ref[0, h] = qkv[:, 2 * D + c:2 * D + c + head_dim].astype(jnp.bfloat16)


# ----------------------------------------------------------------------------
# Kernel 2: per-head attention, head-merge in VMEM, O-projection, residual,
#           LayerNorm2, feed-forward, residual.
# ----------------------------------------------------------------------------
def attn_ffn_kernel(x_ref, q_ref, k_ref, v_ref,
                    wo_ref, bo_ref, g2_ref, be2_ref,
                    w1_ref, b1_ref, w2_ref, b2_ref,
                    out_ref, ctx_ref, *, num_head, head_dim, eps=1e-5):
    x = x_ref[0].astype(jnp.float32)                            # (TQ, D)

    # Per-head attention with plain 2-D matmuls; f32 temporaries are (TQ, S)
    # per head instead of (H, TQ, S), bounding vreg/VMEM pressure.
    # Note (review #10): exp count is H*TQ*S vs 4*hd*H*TQ*S attention flops, so
    # for hd <~ 128 the single EUP slot may bind on v6e/v7x before the MXU.
    for h in range(num_head):
        q = q_ref[0, h]                                         # (TQ, hd) bf16 (pre-scaled)
        k = k_ref[0, h]                                         # (S,  hd) bf16
        v = v_ref[0, h]                                         # (S,  hd) bf16
        logits = jax.lax.dot_general(                           # (TQ, S) f32
            q, k, (((1,), (1,)), ((), ())),
            preferred_element_type=jnp.float32)
        m = jnp.max(logits, axis=-1, keepdims=True)
        e = jnp.exp(logits - m)
        denom = jnp.sum(e, axis=-1, keepdims=True)
        p = e * pl.reciprocal(denom, approx=True)               # softmax (f32)
        ctx_h = jnp.dot(p.astype(jnp.bfloat16), v,              # (TQ, hd) f32
                        preferred_element_type=jnp.float32)
        # Merge heads into a lane-dense (TQ, D) VMEM buffer.
        ctx_ref[:, h * head_dim:(h + 1) * head_dim] = ctx_h

    # Output projection on the merged context: full-D contraction on the MXU
    # instead of an hd-contracted per-head dot + cross-head reduce.
    attn = jnp.dot(ctx_ref[...].astype(jnp.bfloat16), wo_ref[...],
                   preferred_element_type=jnp.float32) + bo_ref[...]

    # TODO(synk): nn.Dropout is identity in eval mode; train-time stochastic
    # dropout (attention weights and activations) is not implemented.
    y1 = attn + x                                               # residual (rescale=False)

    mu = jnp.mean(y1, axis=-1, keepdims=True)
    var = jnp.mean((y1 - mu) ** 2, axis=-1, keepdims=True)
    y2n = ((y1 - mu) * jax.lax.rsqrt(var + eps) * g2_ref[...] + be2_ref[...]
           ).astype(jnp.bfloat16)

    hid = jnp.dot(y2n, w1_ref[...], preferred_element_type=jnp.float32) + b1_ref[...]
    hid = jnp.maximum(hid, 0.0).astype(jnp.bfloat16)            # relu
    ff = jnp.dot(hid, w2_ref[...], preferred_element_type=jnp.float32) + b2_ref[...]

    out_ref[0] = (ff + y1).astype(out_ref.dtype)


# ----------------------------------------------------------------------------
# Wrapper
# ----------------------------------------------------------------------------
def transformer_encoder_layer(x, params, num_head=8):
    B, S, D = x.shape
    F = params["w1"].shape[1]
    assert D % num_head == 0
    hd = D // num_head
    scale = 1.0 / math.sqrt(hd)
    bf16 = jnp.bfloat16

    vmem_limit = _vmem_budget_bytes()
    TQ = _pick_row_tile(B, S, vmem_limit)
    nq = S // TQ

    # Fuse Q/K/V into one (D, 3D) weight / (1, 3D) bias; fold the attention
    # scale into the Q columns (linear, so weight and bias both scale).
    wqkv = jnp.concatenate(
        [params["wq"] * scale, params["wk"], params["wv"]], axis=1).astype(bf16)
    bqkv = jnp.concatenate(
        [params["bq"] * scale, params["bk"], params["bv"]], axis=1)   # f32 (1, 3D)
    wo = params["wo"].astype(bf16)
    w1, w2 = params["w1"].astype(bf16), params["w2"].astype(bf16)
    g1, be1, g2, be2 = params["g1"], params["be1"], params["g2"], params["be2"]
    bo, b1, b2 = params["bo"], params["b1"], params["b2"]

    compiler_params = pltpu.CompilerParams(
        dimension_semantics=("parallel", "parallel"),
        vmem_limit_bytes=vmem_limit)

    # ------------------ stage 1: LN1 + fused QKV projection ------------------
    cost1 = pl.CostEstimate(
        flops=int(2 * B * S * D * 3 * D),
        transcendentals=int(B * S),
        bytes_accessed=int(4 * B * S * D + 2 * 3 * D * D + 4 * 3 * D + 8 * D
                           + 3 * 2 * B * S * D))

    qh, kh, vh = pl.pallas_call(
        functools.partial(ln1_qkv_kernel, num_head=num_head, head_dim=hd),
        out_shape=tuple(jax.ShapeDtypeStruct((B, num_head, S, hd), bf16)
                        for _ in range(3)),
        grid_spec=pltpu.PrefetchScalarGridSpec(
            num_scalar_prefetch=0,
            grid=(B, nq),
            in_specs=[
                pl.BlockSpec((1, TQ, D), lambda b, i: (b, i, 0)),     # x row tile
                _invariant_spec((D, 3 * D)),                          # wqkv
                _invariant_spec((1, 3 * D)),                          # bqkv
                _invariant_spec((1, D)), _invariant_spec((1, D)),     # ln1 gamma/beta
            ],
            out_specs=[pl.BlockSpec((1, num_head, TQ, hd),
                                    lambda b, i: (b, 0, i, 0))] * 3,
        ),
        compiler_params=compiler_params,
        cost_estimate=cost1,
    )(x, wqkv, bqkv, g1, be1)

    # ------------------ stage 2: attention + O-proj + FFN --------------------
    cost2 = pl.CostEstimate(
        flops=int(4 * B * S * S * D + 2 * B * S * D * D + 4 * B * S * D * F),
        transcendentals=int(B * num_head * S * S + B * num_head * S + B * S),
        # K/V have a constant index map over the q-tile axis, so they are
        # charged once per batch element, not once per q tile.
        bytes_accessed=int(4 * B * S * D            # x (read, f32)
                           + 2 * B * S * D          # q (read, bf16)
                           + 2 * 2 * B * S * D      # k + v (read once, bf16)
                           + 2 * (D * D + 2 * D * F)  # wo, w1, w2 (bf16)
                           + 4 * B * S * D          # out (write, f32)
                           + 4 * (4 * D + F)))      # biases / LN params

    out = pl.pallas_call(
        functools.partial(attn_ffn_kernel, num_head=num_head, head_dim=hd),
        out_shape=jax.ShapeDtypeStruct((B, S, D), jnp.float32),
        grid_spec=pltpu.PrefetchScalarGridSpec(
            num_scalar_prefetch=0,
            grid=(B, nq),
            in_specs=[
                pl.BlockSpec((1, TQ, D), lambda b, i: (b, i, 0)),                 # x tile
                pl.BlockSpec((1, num_head, TQ, hd), lambda b, i: (b, 0, i, 0)),   # q tile
                pl.BlockSpec((1, num_head, S, hd), lambda b, i: (b, 0, 0, 0)),    # k (resident)
                pl.BlockSpec((1, num_head, S, hd), lambda b, i: (b, 0, 0, 0)),    # v (resident)
                _invariant_spec((D, D)), _invariant_spec((1, D)),                 # wo, bo
                _invariant_spec((1, D)), _invariant_spec((1, D)),                 # ln2 gamma/beta
                _invariant_spec((D, F)), _invariant_spec((1, F)),                 # w1, b1
                _invariant_spec((F, D)), _invariant_spec((1, D)),                 # w2, b2
            ],
            out_specs=pl.BlockSpec((1, TQ, D), lambda b, i: (b, i, 0)),
            scratch_shapes=[pltpu.VMEM((TQ, D), jnp.float32)],                    # merged ctx
        ),
        compiler_params=compiler_params,
        cost_estimate=cost2,
    )(x, qh, kh, vh, wo, bo, g2, be2, w1, b1, w2, b2)

    return out


# ----------------------------------------------------------------------------
# Pure-JAX f32 reference mirroring the PyTorch forward pass (eval mode).
# ----------------------------------------------------------------------------
def reference(x, p, num_head=8, eps=1e-5):
    def ln(v, g, b):
        mu = v.mean(-1, keepdims=True)
        var = ((v - mu) ** 2).mean(-1, keepdims=True)
        return (v - mu) / jnp.sqrt(var + eps) * g + b

    B, S, D = x.shape
    hd = D // num_head
    y1n = ln(x, p["g1"], p["be1"])
    q = y1n @ p["wq"] + p["bq"]
    k = y1n @ p["wk"] + p["bk"]
    v = y1n @ p["wv"] + p["bv"]
    q = q.reshape(B, S, num_head, hd).transpose(0, 2, 1, 3)
    k = k.reshape(B, S, num_head, hd).transpose(0, 2, 1, 3)
    v = v.reshape(B, S, num_head, hd).transpose(0, 2, 1, 3)
    logits = jnp.einsum("bhqd,bhkd->bhqk", q, k) / math.sqrt(hd)
    w = jax.nn.softmax(logits, axis=-1)
    ctx = jnp.einsum("bhqk,bhkd->bhqd", w, v)
    ctx = ctx.transpose(0, 2, 1, 3).reshape(B, S, D)
    y1 = ctx @ p["wo"] + p["bo"] + x
    y2n = ln(y1, p["g2"], p["be2"])
    ff = jnp.maximum(y2n @ p["w1"] + p["b1"], 0.0) @ p["w2"] + p["b2"]
    return ff + y1


def make_params(key, D, F):
    ks = jax.random.split(key, 8)
    s = 0.05
    return {
        "wq": s * jax.random.normal(ks[0], (D, D), jnp.float32),
        "bq": jnp.zeros((1, D), jnp.float32),
        "wk": s * jax.random.normal(ks[1], (D, D), jnp.float32),
        "bk": jnp.zeros((1, D), jnp.float32),
        "wv": s * jax.random.normal(ks[2], (D, D), jnp.float32),
        "bv": jnp.zeros((1, D), jnp.float32),
        "wo": s * jax.random.normal(ks[3], (D, D), jnp.float32),
        "bo": 0.01 * jnp.ones((1, D), jnp.float32),
        "g1": jnp.ones((1, D), jnp.float32),
        "be1": jnp.zeros((1, D), jnp.float32),
        "g2": jnp.ones((1, D), jnp.float32),
        "be2": jnp.zeros((1, D), jnp.float32),
        "w1": s * jax.random.normal(ks[4], (D, F), jnp.float32),
        "b1": jnp.zeros((1, F), jnp.float32),
        "w2": s * jax.random.normal(ks[5], (F, D), jnp.float32),
        "b2": jnp.zeros((1, D), jnp.float32),
    }


if __name__ == "__main__":
    B, S, D, H = 2, 8, 32, 8        # batch, seq, hidden (size), heads
    F = 4 * D                       # ff_size = size * 4 (module default)

    key = jax.random.PRNGKey(0)
    kx, kp = jax.random.split(key)
    x = jax.random.normal(kx, (B, S, D), jnp.float32)
    params = make_params(kp, D, F)

    out = transformer_encoder_layer(x, params, num_head=H)
    out = jax.block_until_ready(out)

    ref = reference(x, params, num_head=H)
    assert out.shape == (B, S, D)
    err = float(jnp.max(jnp.abs(out - ref)))
    # bf16 matmul operands + approx reciprocal vs. a pure-f32 reference.
    assert jnp.allclose(out, ref, atol=2e-2, rtol=2e-2), err
    print("KERNEL_OK")
</pallas_src>

<mosaic_0001>
module attributes {stable_mosaic.version = 11 : i64} {
  func.func @ln1_qkv_kernel(%arg0: i32, %arg1: i32, %arg2: memref<1x8x32xf32, #tpu.memory_space<vmem>>, %arg3: memref<32x96xbf16, #tpu.memory_space<vmem>>, %arg4: memref<1x96xf32, #tpu.memory_space<vmem>>, %arg5: memref<1x32xf32, #tpu.memory_space<vmem>>, %arg6: memref<1x32xf32, #tpu.memory_space<vmem>>, %arg7: memref<1x8x8x4xbf16, #tpu.memory_space<vmem>>, %arg8: memref<1x8x8x4xbf16, #tpu.memory_space<vmem>>, %arg9: memref<1x8x8x4xbf16, #tpu.memory_space<vmem>>) attributes {dimension_semantics = [#tpu.dimension_semantics<parallel>, #tpu.dimension_semantics<parallel>], iteration_bounds = array<i64: 2, 1>, scalar_prefetch = 0 : i64, scratch_operands = 0 : i64, tpu.core_type = #tpu.core_type<tc>, window_params = [{transform_indices = @transform_0, window_bounds = array<i64: 1, 8, 32>}, {pipeline_mode = #tpu.pipeline_mode<synchronous>, transform_indices = @transform_1, window_bounds = array<i64: 32, 96>}, {pipeline_mode = #tpu.pipeline_mode<synchronous>, transform_indices = @transform_2, window_bounds = array<i64: 1, 96>}, {pipeline_mode = #tpu.pipeline_mode<synchronous>, transform_indices = @transform_3, window_bounds = array<i64: 1, 32>}, {pipeline_mode = #tpu.pipeline_mode<synchronous>, transform_indices = @transform_4, window_bounds = array<i64: 1, 32>}, {transform_indices = @transform_5, window_bounds = array<i64: 1, 8, 8, 4>}, {transform_indices = @transform_6, window_bounds = array<i64: 1, 8, 8, 4>}, {transform_indices = @transform_7, window_bounds = array<i64: 1, 8, 8, 4>}]} {
    %c0 = arith.constant 0 : index
    %c0_0 = arith.constant 0 : index
    %c0_1 = arith.constant 0 : index
    %0 = vector.load %arg2[%c0, %c0_0, %c0_1] : memref<1x8x32xf32, #tpu.memory_space<vmem>>, vector<1x8x32xf32>
    %1 = vector.shape_cast %0 : vector<1x8x32xf32> to vector<8x32xf32>
    %cst = arith.constant dense<0.000000e+00> : vector<8xf32>
    %2 = vector.multi_reduction <add>, %1, %cst [1] : vector<8x32xf32> to vector<8xf32>
    %3 = vector.shape_cast %2 : vector<8xf32> to vector<8x1xf32>
    %cst_2 = arith.constant 3.200000e+01 : f32
    %4 = vector.broadcast %cst_2 : f32 to vector<8x1xf32>
    %5 = arith.divf %3, %4 : vector<8x1xf32>
    %6 = vector.broadcast %5 : vector<8x1xf32> to vector<8x32xf32>
    %7 = arith.subf %1, %6 : vector<8x32xf32>
    %8 = arith.mulf %7, %7 : vector<8x32xf32>
    %cst_3 = arith.constant dense<0.000000e+00> : vector<8xf32>
    %9 = vector.multi_reduction <add>, %8, %cst_3 [1] : vector<8x32xf32> to vector<8xf32>
    %10 = vector.shape_cast %9 : vector<8xf32> to vector<8x1xf32>
    %cst_4 = arith.constant 3.200000e+01 : f32
    %11 = vector.broadcast %cst_4 : f32 to vector<8x1xf32>
    %12 = arith.divf %10, %11 : vector<8x1xf32>
    %13 = vector.broadcast %5 : vector<8x1xf32> to vector<8x32xf32>
    %14 = arith.subf %1, %13 : vector<8x32xf32>
    %cst_5 = arith.constant 9.99999974E-6 : f32
    %15 = vector.broadcast %cst_5 : f32 to vector<8x1xf32>
    %16 = arith.addf %12, %15 : vector<8x1xf32>
    %17 = math.rsqrt %16 : vector<8x1xf32>
    %18 = vector.broadcast %17 : vector<8x1xf32> to vector<8x32xf32>
    %19 = arith.mulf %14, %18 : vector<8x32xf32>
    %c0_6 = arith.constant 0 : index
    %c0_7 = arith.constant 0 : index
    %20 = vector.load %arg5[%c0_6, %c0_7] : memref<1x32xf32, #tpu.memory_space<vmem>>, vector<1x32xf32>
    %21 = vector.broadcast %20 : vector<1x32xf32> to vector<8x32xf32>
    %22 = arith.mulf %19, %21 : vector<8x32xf32>
    %c0_8 = arith.constant 0 : index
    %c0_9 = arith.constant 0 : index
    %23 = vector.load %arg6[%c0_8, %c0_9] : memref<1x32xf32, #tpu.memory_space<vmem>>, vector<1x32xf32>
    %24 = vector.broadcast %23 : vector<1x32xf32> to vector<8x32xf32>
    %25 = arith.addf %22, %24 : vector<8x32xf32>
    %26 = arith.truncf %25 : vector<8x32xf32> to vector<8x32xbf16>
    %c0_10 = arith.constant 0 : index
    %c0_11 = arith.constant 0 : index
    %27 = vector.load %arg3[%c0_10, %c0_11] : memref<32x96xbf16, #tpu.memory_space<vmem>>, vector<32x96xbf16>
    %cst_12 = arith.constant dense<0.000000e+00> : vector<8x96xf32>
    %28 = tpu.matmul %26, %27, %cst_12 {dimension_numbers = #tpu.dot_dimension_numbers<[1], [0], [0], [1], [0, 0, 1, 1], [], []>} : vector<8x32xbf16>, vector<32x96xbf16>, vector<8x96xf32> -> vector<8x96xf32>
    %c0_13 = arith.constant 0 : index
    %c0_14 = arith.constant 0 : index
    %29 = vector.load %arg4[%c0_13, %c0_14] : memref<1x96xf32, #tpu.memory_space<vmem>>, vector<1x96xf32>
    %30 = vector.broadcast %29 : vector<1x96xf32> to vector<8x96xf32>
    %31 = arith.addf %28, %30 : vector<8x96xf32>
    %32 = vector.extract_strided_slice %31 {offsets = [0, 0], sizes = [8, 4], strides = [1, 1]} : vector<8x96xf32> to vector<8x4xf32>
    %33 = arith.truncf %32 : vector<8x4xf32> to vector<8x4xbf16>
    %c0_15 = arith.constant 0 : index
    %c0_16 = arith.constant 0 : index
    %c0_17 = arith.constant 0 : index
    %c0_18 = arith.constant 0 : index
    %34 = vector.load %arg7[%c0_15, %c0_16, %c0_17, %c0_18] : memref<1x8x8x4xbf16, #tpu.memory_space<vmem>>, vector<1x1x8x4xbf16>
    %35 = vector.shape_cast %34 : vector<1x1x8x4xbf16> to vector<8x4xbf16>
    %36 = vector.shape_cast %33 : vector<8x4xbf16> to vector<1x1x8x4xbf16>
    tpu.vector_store %arg7[%c0_15, %c0_16, %c0_17, %c0_18], %36 {strides = array<i32>} : memref<1x8x8x4xbf16, #tpu.memory_space<vmem>>, vector<1x1x8x4xbf16>,
    %37 = vector.extract_strided_slice %31 {offsets = [0, 32], sizes = [8, 4], strides = [1, 1]} : vector<8x96xf32> to vector<8x4xf32>
    %38 = arith.truncf %37 : vector<8x4xf32> to vector<8x4xbf16>
    %c0_19 = arith.constant 0 : index
    %c0_20 = arith.constant 0 : index
    %c0_21 = arith.constant 0 : index
    %c0_22 = arith.constant 0 : index
    %39 = vector.load %arg8[%c0_19, %c0_20, %c0_21, %c0_22] : memref<1x8x8x4xbf16, #tpu.memory_space<vmem>>, vector<1x1x8x4xbf16>
    %40 = vector.shape_cast %39 : vector<1x1x8x4xbf16> to vector<8x4xbf16>
    %41 = vector.shape_cast %38 : vector<8x4xbf16> to vector<1x1x8x4xbf16>
    tpu.vector_store %arg8[%c0_19, %c0_20, %c0_21, %c0_22], %41 {strides = array<i32>} : memref<1x8x8x4xbf16, #tpu.memory_space<vmem>>, vector<1x1x8x4xbf16>,
    %42 = vector.extract_strided_slice %31 {offsets = [0, 64], sizes = [8, 4], strides = [1, 1]} : vector<8x96xf32> to vector<8x4xf32>
    %43 = arith.truncf %42 : vector<8x4xf32> to vector<8x4xbf16>
    %c0_23 = arith.constant 0 : index
    %c0_24 = arith.constant 0 : index
    %c0_25 = arith.constant 0 : index
    %c0_26 = arith.constant 0 : index
    %44 = vector.load %arg9[%c0_23, %c0_24, %c0_25, %c0_26] : memref<1x8x8x4xbf16, #tpu.memory_space<vmem>>, vector<1x1x8x4xbf16>
    %45 = vector.shape_cast %44 : vector<1x1x8x4xbf16> to vector<8x4xbf16>
    %46 = vector.shape_cast %43 : vector<8x4xbf16> to vector<1x1x8x4xbf16>
    tpu.vector_store %arg9[%c0_23, %c0_24, %c0_25, %c0_26], %46 {strides = array<i32>} : memref<1x8x8x4xbf16, #tpu.memory_space<vmem>>, vector<1x1x8x4xbf16>,
    %47 = vector.extract_strided_slice %31 {offsets = [0, 4], sizes = [8, 4], strides = [1, 1]} : vector<8x96xf32> to vector<8x4xf32>
    %48 = arith.truncf %47 : vector<8x4xf32> to vector<8x4xbf16>
    %c0_27 = arith.constant 0 : index
    %c1 = arith.constant 1 : index
    %c0_28 = arith.constant 0 : index
    %c0_29 = arith.constant 0 : index
    %49 = vector.load %arg7[%c0_27, %c1, %c0_28, %c0_29] : memref<1x8x8x4xbf16, #tpu.memory_space<vmem>>, vector<1x1x8x4xbf16>
    %50 = vector.shape_cast %49 : vector<1x1x8x4xbf16> to vector<8x4xbf16>
    %51 = vector.shape_cast %48 : vector<8x4xbf16> to vector<1x1x8x4xbf16>
    tpu.vector_store %arg7[%c0_27, %c1, %c0_28, %c0_29], %51 {strides = array<i32>} : memref<1x8x8x4xbf16, #tpu.memory_space<vmem>>, vector<1x1x8x4xbf16>,
    %52 = vector.extract_strided_slice %31 {offsets = [0, 36], sizes = [8, 4], strides = [1, 1]} : vector<8x96xf32> to vector<8x4xf32>
    %53 = arith.truncf %52 : vector<8x4xf32> to vector<8x4xbf16>
    %c0_30 = arith.constant 0 : index
    %c1_31 = arith.constant 1 : index
    %c0_32 = arith.constant 0 : index
    %c0_33 = arith.constant 0 : index
    %54 = vector.load %arg8[%c0_30, %c1_31, %c0_32, %c0_33] : memref<1x8x8x4xbf16, #tpu.memory_space<vmem>>, vector<1x1x8x4xbf16>
    %55 = vector.shape_cast %54 : vector<1x1x8x4xbf16> to vector<8x4xbf16>
    %56 = vector.shape_cast %53 : vector<8x4xbf16> to vector<1x1x8x4xbf16>
    tpu.vector_store %arg8[%c0_30, %c1_31, %c0_32, %c0_33], %56 {strides = array<i32>} : memref<1x8x8x4xbf16, #tpu.memory_space<vmem>>, vector<1x1x8x4xbf16>,
    %57 = vector.extract_strided_slice %31 {offsets = [0, 68], sizes = [8, 4], strides = [1, 1]} : vector<8x96xf32> to vector<8x4xf32>
    %58 = arith.truncf %57 : vector<8x4xf32> to vector<8x4xbf16>
    %c0_34 = arith.constant 0 : index
    %c1_35 = arith.constant 1 : index
    %c0_36 = arith.constant 0 : index
    %c0_37 = arith.constant 0 : index
    %59 = vector.load %arg9[%c0_34, %c1_35, %c0_36, %c0_37] : memref<1x8x8x4xbf16, #tpu.memory_space<vmem>>, vector<1x1x8x4xbf16>
    %60 = vector.shape_cast %59 : vector<1x1x8x4xbf16> to vector<8x4xbf16>
    %61 = vector.shape_cast %58 : vector<8x4xbf16> to vector<1x1x8x4xbf16>
    tpu.vector_store %arg9[%c0_34, %c1_35, %c0_36, %c0_37], %61 {strides = array<i32>} : memref<1x8x8x4xbf16, #tpu.memory_space<vmem>>, vector<1x1x8x4xbf16>,
    %62 = vector.extract_strided_slice %31 {offsets = [0, 8], sizes = [8, 4], strides = [1, 1]} : vector<8x96xf32> to vector<8x4xf32>
    %63 = arith.truncf %62 : vector<8x4xf32> to vector<8x4xbf16>
    %c0_38 = arith.constant 0 : index
    %c2 = arith.constant 2 : index
    %c0_39 = arith.constant 0 : index
    %c0_40 = arith.constant 0 : index
    %64 = vector.load %arg7[%c0_38, %c2, %c0_39, %c0_40] : memref<1x8x8x4xbf16, #tpu.memory_space<vmem>>, vector<1x1x8x4xbf16>
    %65 = vector.shape_cast %64 : vector<1x1x8x4xbf16> to vector<8x4xbf16>
    %66 = vector.shape_cast %63 : vector<8x4xbf16> to vector<1x1x8x4xbf16>
    tpu.vector_store %arg7[%c0_38, %c2, %c0_39, %c0_40], %66 {strides = array<i32>} : memref<1x8x8x4xbf16, #tpu.memory_space<vmem>>, vector<1x1x8x4xbf16>,
    %67 = vector.extract_strided_slice %31 {offsets = [0, 40], sizes = [8, 4], strides = [1, 1]} : vector<8x96xf32> to vector<8x4xf32>
    %68 = arith.truncf %67 : vector<8x4xf32> to vector<8x4xbf16>
    %c0_41 = arith.constant 0 : index
    %c2_42 = arith.constant 2 : index
    %c0_43 = arith.constant 0 : index
    %c0_44 = arith.constant 0 : index
    %69 = vector.load %arg8[%c0_41, %c2_42, %c0_43, %c0_44] : memref<1x8x8x4xbf16, #tpu.memory_space<vmem>>, vector<1x1x8x4xbf16>
    %70 = vector.shape_cast %69 : vector<1x1x8x4xbf16> to vector<8x4xbf16>
    %71 = vector.shape_cast %68 : vector<8x4xbf16> to vector<1x1x8x4xbf16>
    tpu.vector_store %arg8[%c0_41, %c2_42, %c0_43, %c0_44], %71 {strides = array<i32>} : memref<1x8x8x4xbf16, #tpu.memory_space<vmem>>, vector<1x1x8x4xbf16>,
    %72 = vector.extract_strided_slice %31 {offsets = [0, 72], sizes = [8, 4], strides = [1, 1]} : vector<8x96xf32> to vector<8x4xf32>
    %73 = arith.truncf %72 : vector<8x4xf32> to vector<8x4xbf16>
    %c0_45 = arith.constant 0 : index
    %c2_46 = arith.constant 2 : index
    %c0_47 = arith.constant 0 : index
    %c0_48 = arith.constant 0 : index
    %74 = vector.load %arg9[%c0_45, %c2_46, %c0_47, %c0_48] : memref<1x8x8x4xbf16, #tpu.memory_space<vmem>>, vector<1x1x8x4xbf16>
    %75 = vector.shape_cast %74 : vector<1x1x8x4xbf16> to vector<8x4xbf16>
    %76 = vector.shape_cast %73 : vector<8x4xbf16> to vector<1x1x8x4xbf16>
    tpu.vector_store %arg9[%c0_45, %c2_46, %c0_47, %c0_48], %76 {strides = array<i32>} : memref<1x8x8x4xbf16, #tpu.memory_space<vmem>>, vector<1x1x8x4xbf16>,
    %77 = vector.extract_strided_slice %31 {offsets = [0, 12], sizes = [8, 4], strides = [1, 1]} : vector<8x96xf32> to vector<8x4xf32>
    %78 = arith.truncf %77 : vector<8x4xf32> to vector<8x4xbf16>
    %c0_49 = arith.constant 0 : index
    %c3 = arith.constant 3 : index
    %c0_50 = arith.constant 0 : index
    %c0_51 = arith.constant 0 : index
    %79 = vector.load %arg7[%c0_49, %c3, %c0_50, %c0_51] : memref<1x8x8x4xbf16, #tpu.memory_space<vmem>>, vector<1x1x8x4xbf16>
    %80 = vector.shape_cast %79 : vector<1x1x8x4xbf16> to vector<8x4xbf16>
    %81 = vector.shape_cast %78 : vector<8x4xbf16> to vector<1x1x8x4xbf16>
    tpu.vector_store %arg7[%c0_49, %c3, %c0_50, %c0_51], %81 {strides = array<i32>} : memref<1x8x8x4xbf16, #tpu.memory_space<vmem>>, vector<1x1x8x4xbf16>,
    %82 = vector.extract_strided_slice %31 {offsets = [0, 44], sizes = [8, 4], strides = [1, 1]} : vector<8x96xf32> to vector<8x4xf32>
    %83 = arith.truncf %82 : vector<8x4xf32> to vector<8x4xbf16>
    %c0_52 = arith.constant 0 : index
    %c3_53 = arith.constant 3 : index
    %c0_54 = arith.constant 0 : index
    %c0_55 = arith.constant 0 : index
    %84 = vector.load %arg8[%c0_52, %c3_53, %c0_54, %c0_55] : memref<1x8x8x4xbf16, #tpu.memory_space<vmem>>, vector<1x1x8x4xbf16>
    %85 = vector.shape_cast %84 : vector<1x1x8x4xbf16> to vector<8x4xbf16>
    %86 = vector.shape_cast %83 : vector<8x4xbf16> to vector<1x1x8x4xbf16>
    tpu.vector_store %arg8[%c0_52, %c3_53, %c0_54, %c0_55], %86 {strides = array<i32>} : memref<1x8x8x4xbf16, #tpu.memory_space<vmem>>, vector<1x1x8x4xbf16>,
    %87 = vector.extract_strided_slice %31 {offsets = [0, 76], sizes = [8, 4], strides = [1, 1]} : vector<8x96xf32> to vector<8x4xf32>
    %88 = arith.truncf %87 : vector<8x4xf32> to vector<8x4xbf16>
    %c0_56 = arith.constant 0 : index
    %c3_57 = arith.constant 3 : index
    %c0_58 = arith.constant 0 : index
    %c0_59 = arith.constant 0 : index
    %89 = vector.load %arg9[%c0_56, %c3_57, %c0_58, %c0_59] : memref<1x8x8x4xbf16, #tpu.memory_space<vmem>>, vector<1x1x8x4xbf16>
    %90 = vector.shape_cast %89 : vector<1x1x8x4xbf16> to vector<8x4xbf16>
    %91 = vector.shape_cast %88 : vector<8x4xbf16> to vector<1x1x8x4xbf16>
    tpu.vector_store %arg9[%c0_56, %c3_57, %c0_58, %c0_59], %91 {strides = array<i32>} : memref<1x8x8x4xbf16, #tpu.memory_space<vmem>>, vector<1x1x8x4xbf16>,
    %92 = vector.extract_strided_slice %31 {offsets = [0, 16], sizes = [8, 4], strides = [1, 1]} : vector<8x96xf32> to vector<8x4xf32>
    %93 = arith.truncf %92 : vector<8x4xf32> to vector<8x4xbf16>
    %c0_60 = arith.constant 0 : index
    %c4 = arith.constant 4 : index
    %c0_61 = arith.constant 0 : index
    %c0_62 = arith.constant 0 : index
    %94 = vector.load %arg7[%c0_60, %c4, %c0_61, %c0_62] : memref<1x8x8x4xbf16, #tpu.memory_space<vmem>>, vector<1x1x8x4xbf16>
    %95 = vector.shape_cast %94 : vector<1x1x8x4xbf16> to vector<8x4xbf16>
    %96 = vector.shape_cast %93 : vector<8x4xbf16> to vector<1x1x8x4xbf16>
    tpu.vector_store %arg7[%c0_60, %c4, %c0_61, %c0_62], %96 {strides = array<i32>} : memref<1x8x8x4xbf16, #tpu.memory_space<vmem>>, vector<1x1x8x4xbf16>,
    %97 = vector.extract_strided_slice %31 {offsets = [0, 48], sizes = [8, 4], strides = [1, 1]} : vector<8x96xf32> to vector<8x4xf32>
    %98 = arith.truncf %97 : vector<8x4xf32> to vector<8x4xbf16>
    %c0_63 = arith.constant 0 : index
    %c4_64 = arith.constant 4 : index
    %c0_65 = arith.constant 0 : index
    %c0_66 = arith.constant 0 : index
    %99 = vector.load %arg8[%c0_63, %c4_64, %c0_65, %c0_66] : memref<1x8x8x4xbf16, #tpu.memory_space<vmem>>, vector<1x1x8x4xbf16>
    %100 = vector.shape_cast %99 : vector<1x1x8x4xbf16> to vector<8x4xbf16>
    %101 = vector.shape_cast %98 : vector<8x4xbf16> to vector<1x1x8x4xbf16>
    tpu.vector_store %arg8[%c0_63, %c4_64, %c0_65, %c0_66], %101 {strides = array<i32>} : memref<1x8x8x4xbf16, #tpu.memory_space<vmem>>, vector<1x1x8x4xbf16>,
    %102 = vector.extract_strided_slice %31 {offsets = [0, 80], sizes = [8, 4], strides = [1, 1]} : vector<8x96xf32> to vector<8x4xf32>
    %103 = arith.truncf %102 : vector<8x4xf32> to vector<8x4xbf16>
    %c0_67 = arith.constant 0 : index
    %c4_68 = arith.constant 4 : index
    %c0_69 = arith.constant 0 : index
    %c0_70 = arith.constant 0 : index
    %104 = vector.load %arg9[%c0_67, %c4_68, %c0_69, %c0_70] : memref<1x8x8x4xbf16, #tpu.memory_space<vmem>>, vector<1x1x8x4xbf16>
    %105 = vector.shape_cast %104 : vector<1x1x8x4xbf16> to vector<8x4xbf16>
    %106 = vector.shape_cast %103 : vector<8x4xbf16> to vector<1x1x8x4xbf16>
    tpu.vector_store %arg9[%c0_67, %c4_68, %c0_69, %c0_70], %106 {strides = array<i32>} : memref<1x8x8x4xbf16, #tpu.memory_space<vmem>>, vector<1x1x8x4xbf16>,
    %107 = vector.extract_strided_slice %31 {offsets = [0, 20], sizes = [8, 4], strides = [1, 1]} : vector<8x96xf32> to vector<8x4xf32>
    %108 = arith.truncf %107 : vector<8x4xf32> to vector<8x4xbf16>
    %c0_71 = arith.constant 0 : index
    %c5 = arith.constant 5 : index
    %c0_72 = arith.constant 0 : index
    %c0_73 = arith.constant 0 : index
    %109 = vector.load %arg7[%c0_71, %c5, %c0_72, %c0_73] : memref<1x8x8x4xbf16, #tpu.memory_space<vmem>>, vector<1x1x8x4xbf16>
    %110 = vector.shape_cast %109 : vector<1x1x8x4xbf16> to vector<8x4xbf16>
    %111 = vector.shape_cast %108 : vector<8x4xbf16> to vector<1x1x8x4xbf16>
    tpu.vector_store %arg7[%c0_71, %c5, %c0_72, %c0_73], %111 {strides = array<i32>} : memref<1x8x8x4xbf16, #tpu.memory_space<vmem>>, vector<1x1x8x4xbf16>,
    %112 = vector.extract_strided_slice %31 {offsets = [0, 52], sizes = [8, 4], strides = [1, 1]} : vector<8x96xf32> to vector<8x4xf32>
    %113 = arith.truncf %112 : vector<8x4xf32> to vector<8x4xbf16>
    %c0_74 = arith.constant 0 : index
    %c5_75 = arith.constant 5 : index
    %c0_76 = arith.constant 0 : index
    %c0_77 = arith.constant 0 : index
    %114 = vector.load %arg8[%c0_74, %c5_75, %c0_76, %c0_77] : memref<1x8x8x4xbf16, #tpu.memory_space<vmem>>, vector<1x1x8x4xbf16>
    %115 = vector.shape_cast %114 : vector<1x1x8x4xbf16> to vector<8x4xbf16>
    %116 = vector.shape_cast %113 : vector<8x4xbf16> to vector<1x1x8x4xbf16>
    tpu.vector_store %arg8[%c0_74, %c5_75, %c0_76, %c0_77], %116 {strides = array<i32>} : memref<1x8x8x4xbf16, #tpu.memory_space<vmem>>, vector<1x1x8x4xbf16>,
    %117 = vector.extract_strided_slice %31 {offsets = [0, 84], sizes = [8, 4], strides = [1, 1]} : vector<8x96xf32> to vector<8x4xf32>
    %118 = arith.truncf %117 : vector<8x4xf32> to vector<8x4xbf16>
    %c0_78 = arith.constant 0 : index
    %c5_79 = arith.constant 5 : index
    %c0_80 = arith.constant 0 : index
    %c0_81 = arith.constant 0 : index
    %119 = vector.load %arg9[%c0_78, %c5_79, %c0_80, %c0_81] : memref<1x8x8x4xbf16, #tpu.memory_space<vmem>>, vector<1x1x8x4xbf16>
    %120 = vector.shape_cast %119 : vector<1x1x8x4xbf16> to vector<8x4xbf16>
    %121 = vector.shape_cast %118 : vector<8x4xbf16> to vector<1x1x8x4xbf16>
    tpu.vector_store %arg9[%c0_78, %c5_79, %c0_80, %c0_81], %121 {strides = array<i32>} : memref<1x8x8x4xbf16, #tpu.memory_space<vmem>>, vector<1x1x8x4xbf16>,
    %122 = vector.extract_strided_slice %31 {offsets = [0, 24], sizes = [8, 4], strides = [1, 1]} : vector<8x96xf32> to vector<8x4xf32>
    %123 = arith.truncf %122 : vector<8x4xf32> to vector<8x4xbf16>
    %c0_82 = arith.constant 0 : index
    %c6 = arith.constant 6 : index
    %c0_83 = arith.constant 0 : index
    %c0_84 = arith.constant 0 : index
    %124 = vector.load %arg7[%c0_82, %c6, %c0_83, %c0_84] : memref<1x8x8x4xbf16, #tpu.memory_space<vmem>>, vector<1x1x8x4xbf16>
    %125 = vector.shape_cast %124 : vector<1x1x8x4xbf16> to vector<8x4xbf16>
    %126 = vector.shape_cast %123 : vector<8x4xbf16> to vector<1x1x8x4xbf16>
    tpu.vector_store %arg7[%c0_82, %c6, %c0_83, %c0_84], %126 {strides = array<i32>} : memref<1x8x8x4xbf16, #tpu.memory_space<vmem>>, vector<1x1x8x4xbf16>,
    %127 = vector.extract_strided_slice %31 {offsets = [0, 56], sizes = [8, 4], strides = [1, 1]} : vector<8x96xf32> to vector<8x4xf32>
    %128 = arith.truncf %127 : vector<8x4xf32> to vector<8x4xbf16>
    %c0_85 = arith.constant 0 : index
    %c6_86 = arith.constant 6 : index
    %c0_87 = arith.constant 0 : index
    %c0_88 = arith.constant 0 : index
    %129 = vector.load %arg8[%c0_85, %c6_86, %c0_87, %c0_88] : memref<1x8x8x4xbf16, #tpu.memory_space<vmem>>, vector<1x1x8x4xbf16>
    %130 = vector.shape_cast %129 : vector<1x1x8x4xbf16> to vector<8x4xbf16>
    %131 = vector.shape_cast %128 : vector<8x4xbf16> to vector<1x1x8x4xbf16>
    tpu.vector_store %arg8[%c0_85, %c6_86, %c0_87, %c0_88], %131 {strides = array<i32>} : memref<1x8x8x4xbf16, #tpu.memory_space<vmem>>, vector<1x1x8x4xbf16>,
    %132 = vector.extract_strided_slice %31 {offsets = [0, 88], sizes = [8, 4], strides = [1, 1]} : vector<8x96xf32> to vector<8x4xf32>
    %133 = arith.truncf %132 : vector<8x4xf32> to vector<8x4xbf16>
    %c0_89 = arith.constant 0 : index
    %c6_90 = arith.constant 6 : index
    %c0_91 = arith.constant 0 : index
    %c0_92 = arith.constant 0 : index
    %134 = vector.load %arg9[%c0_89, %c6_90, %c0_91, %c0_92] : memref<1x8x8x4xbf16, #tpu.memory_space<vmem>>, vector<1x1x8x4xbf16>
    %135 = vector.shape_cast %134 : vector<1x1x8x4xbf16> to vector<8x4xbf16>
    %136 = vector.shape_cast %133 : vector<8x4xbf16> to vector<1x1x8x4xbf16>
    tpu.vector_store %arg9[%c0_89, %c6_90, %c0_91, %c0_92], %136 {strides = array<i32>} : memref<1x8x8x4xbf16, #tpu.memory_space<vmem>>, vector<1x1x8x4xbf16>,
    %137 = vector.extract_strided_slice %31 {offsets = [0, 28], sizes = [8, 4], strides = [1, 1]} : vector<8x96xf32> to vector<8x4xf32>
    %138 = arith.truncf %137 : vector<8x4xf32> to vector<8x4xbf16>
    %c0_93 = arith.constant 0 : index
    %c7 = arith.constant 7 : index
    %c0_94 = arith.constant 0 : index
    %c0_95 = arith.constant 0 : index
    %139 = vector.load %arg7[%c0_93, %c7, %c0_94, %c0_95] : memref<1x8x8x4xbf16, #tpu.memory_space<vmem>>, vector<1x1x8x4xbf16>
    %140 = vector.shape_cast %139 : vector<1x1x8x4xbf16> to vector<8x4xbf16>
    %141 = vector.shape_cast %138 : vector<8x4xbf16> to vector<1x1x8x4xbf16>
    tpu.vector_store %arg7[%c0_93, %c7, %c0_94, %c0_95], %141 {strides = array<i32>} : memref<1x8x8x4xbf16, #tpu.memory_space<vmem>>, vector<1x1x8x4xbf16>,
    %142 = vector.extract_strided_slice %31 {offsets = [0, 60], sizes = [8, 4], strides = [1, 1]} : vector<8x96xf32> to vector<8x4xf32>
    %143 = arith.truncf %142 : vector<8x4xf32> to vector<8x4xbf16>
    %c0_96 = arith.constant 0 : index
    %c7_97 = arith.constant 7 : index
    %c0_98 = arith.constant 0 : index
    %c0_99 = arith.constant 0 : index
    %144 = vector.load %arg8[%c0_96, %c7_97, %c0_98, %c0_99] : memref<1x8x8x4xbf16, #tpu.memory_space<vmem>>, vector<1x1x8x4xbf16>
    %145 = vector.shape_cast %144 : vector<1x1x8x4xbf16> to vector<8x4xbf16>
    %146 = vector.shape_cast %143 : vector<8x4xbf16> to vector<1x1x8x4xbf16>
    tpu.vector_store %arg8[%c0_96, %c7_97, %c0_98, %c0_99], %146 {strides = array<i32>} : memref<1x8x8x4xbf16, #tpu.memory_space<vmem>>, vector<1x1x8x4xbf16>,
    %147 = vector.extract_strided_slice %31 {offsets = [0, 92], sizes = [8, 4], strides = [1, 1]} : vector<8x96xf32> to vector<8x4xf32>
    %148 = arith.truncf %147 : vector<8x4xf32> to vector<8x4xbf16>
    %c0_100 = arith.constant 0 : index
    %c7_101 = arith.constant 7 : index
    %c0_102 = arith.constant 0 : index
    %c0_103 = arith.constant 0 : index
    %149 = vector.load %arg9[%c0_100, %c7_101, %c0_102, %c0_103] : memref<1x8x8x4xbf16, #tpu.memory_space<vmem>>, vector<1x1x8x4xbf16>
    %150 = vector.shape_cast %149 : vector<1x1x8x4xbf16> to vector<8x4xbf16>
    %151 = vector.shape_cast %148 : vector<8x4xbf16> to vector<1x1x8x4xbf16>
    tpu.vector_store %arg9[%c0_100, %c7_101, %c0_102, %c0_103], %151 {strides = array<i32>} : memref<1x8x8x4xbf16, #tpu.memory_space<vmem>>, vector<1x1x8x4xbf16>,
    return
  }
  func.func @transform_0(%arg0: i32, %arg1: i32) -> (i32, i32, i32) {
    %c0_i32 = arith.constant 0 : i32
    %c0_i32_0 = arith.constant 0 : i32
    return %arg0, %arg1, %c0_i32 : i32, i32, i32
  }
  func.func @transform_1(%arg0: i32, %arg1: i32) -> (i32, i32) {
    %c0_i32 = arith.constant 0 : i32
    %c0_i32_0 = arith.constant 0 : i32
    %c0_i32_1 = arith.constant 0 : i32
    return %c0_i32, %c0_i32_0 : i32, i32
  }
  func.func @transform_2(%arg0: i32, %arg1: i32) -> (i32, i32) {
    %c0_i32 = arith.constant 0 : i32
    %c0_i32_0 = arith.constant 0 : i32
    %c0_i32_1 = arith.constant 0 : i32
    return %c0_i32, %c0_i32_0 : i32, i32
  }
  func.func @transform_3(%arg0: i32, %arg1: i32) -> (i32, i32) {
    %c0_i32 = arith.constant 0 : i32
    %c0_i32_0 = arith.constant 0 : i32
    %c0_i32_1 = arith.constant 0 : i32
    return %c0_i32, %c0_i32_0 : i32, i32
  }
  func.func @transform_4(%arg0: i32, %arg1: i32) -> (i32, i32) {
    %c0_i32 = arith.constant 0 : i32
    %c0_i32_0 = arith.constant 0 : i32
    %c0_i32_1 = arith.constant 0 : i32
    return %c0_i32, %c0_i32_0 : i32, i32
  }
  func.func @transform_5(%arg0: i32, %arg1: i32) -> (i32, i32, i32, i32) {
    %c0_i32 = arith.constant 0 : i32
    %c0_i32_0 = arith.constant 0 : i32
    %c0_i32_1 = arith.constant 0 : i32
    return %arg0, %c0_i32, %arg1, %c0_i32_0 : i32, i32, i32, i32
  }
  func.func @transform_6(%arg0: i32, %arg1: i32) -> (i32, i32, i32, i32) {
    %c0_i32 = arith.constant 0 : i32
    %c0_i32_0 = arith.constant 0 : i32
    %c0_i32_1 = arith.constant 0 : i32
    return %arg0, %c0_i32, %arg1, %c0_i32_0 : i32, i32, i32, i32
  }
  func.func @transform_7(%arg0: i32, %arg1: i32) -> (i32, i32, i32, i32) {
    %c0_i32 = arith.constant 0 : i32
    %c0_i32_0 = arith.constant 0 : i32
    %c0_i32_1 = arith.constant 0 : i32
    return %arg0, %c0_i32, %arg1, %c0_i32_0 : i32, i32, i32, i32
  }
}

</mosaic_0001>

<bundles_post_ra>
// kernel: tpu_custom_call.1
= control target key start
LH: loop header
LB: loop body
LE: loop exit
PB: predicated region body
PF: predicated region fallthrough
CT: control target
= control target key end

     0   :  { %s1295_s0 = inlined_call_operand.hbm [shape: f32[2,8,32], index: 0, kind: input, shape index: {}]   ;;  %s1296_s1 = inlined_call_operand.hbm [shape: bf16[32,96], index: 1, kind: input, shape index: {}]   ;;  %s1297_s2 = inlined_call_operand.vmem [shape: f32[1,96], index: 2, kind: input, shape index: {}]   ;;  %s1298_s3 = inlined_call_operand.vmem [shape: f32[1,32], index: 3, kind: input, shape index: {}]   ;;  %s1299_s4 = inlined_call_operand.vmem [shape: f32[1,32], index: 4, kind: input, shape index: {}]   ;;  %s1300_s5 = inlined_call_operand.vmem [shape: bf16[2,8,8,4], index: 5, kind: output, shape index: {0}]   ;;  %s1301_s6 = inlined_call_operand.vmem [shape: bf16[2,8,8,4], index: 6, kind: output, shape index: {1}]   ;;  %s1302_s7 = inlined_call_operand.vmem [shape: bf16[2,8,8,4], index: 7, kind: output, shape index: {2}]  }
   0x1   :  { %1304 = sst [smem:[#allocation9_spill]] %s1296_s1 }
   0x2   :  { %13 = vsyncpa [#allocation3], 0 }
   0x3   :  { %15 = vsyncpa [#allocation3 + $0x1], 0 }
   0x4   :  { %16 = vsyncpa [#allocation5], 0  ;;  %s1104_s24 = smov 0   ;;  %s1106_s25 = smov 0  }
   0x5   :  { %s1108_s26 = smov 0   ;;  %s1110_s27 = smov 0  }
   0x6   :  { %s1112_s28 = smov 0   ;;  %s1114_s29 = smov 0  }
   0x7 LB: > { %s769_s30 = sadd.s32 4294967295, %s1035_s29   ;;  %p771_p0 = scmp.ge.s32.totalorder %s1035_s29, 1  ;;  %s1035_s29 = sphi %s1114_s29, %s22_s29   ;;  %s1031_s28 = sphi %s1112_s28, %s1316_s28   ;;  %s1027_s27 = sphi %s1110_s27, %s1315_s27   ;;  %s1023_s26 = sphi %s1108_s26, %s1314_s26   ;;  %s1019_s25 = sphi %s1106_s25, %s1313_s25   ;;  %s1015_s24 = sphi %s1104_s24, %s1312_s24  }
   0x8   : > { %p1136_p1 = scmp.eq.s32.totalorder %s769_s30, 0  ;;  %p235_p2 = scmp.lt.s32.totalorder %s1035_s29, 3 }
   0x9   : > { %s1306_s1 = sld [smem:[#allocation9_spill]]  ;;  %s1037_s13 = smov [#allocation4]  }
   0xa   : > { %p1144_p3 = pnand %p771_p0, %p235_p2  ;;  %s248_s14 = sshll.u32 %s1037_s13, 4  ;;  %s249_s14 = int_to_ptr.vmem [resolvable:$true] %s248_s14 }
   0xb   : > { %s1038_s15 = smov 64   ;;  %s1039_s16 = smov 4  }
   0xc   : > { %p828_p4 = pneg %p1144_p3  ;;  %s34_s17 = sadd.s32 1, %s1031_s28 }
   0xd   : > { %p36_p6 = scmp.ge.s32.totalorder %s34_s17, 2  ;;  %p50_p7 = scmp.ne.s32.totalorder %s1023_s26, %s1019_s25 }
   0xe   : > { %p829_p5 = pnand %p828_p4, %p1136_p1  ;;  %p51_p8 = scmp.eq.s32.totalorder %s1035_s29, 0 }
   0xf   : > { %s246_s11 = sshll.u32 %s1306_s1, 4  ;;  %s1318_s17 = smov (%p36_p6, %s34_s17), 0  ;;  %s247_s11 = int_to_ptr.hbm [resolvable:$true] %s246_s11 }
  0x10   : > { %831 = dma.hbm_to_vmem [thread:$0]  (!%p829_p5), %s247_s11, 256, %s249_s14, [#allocation5], %s1038_s15, %s1038_s15, %s1039_s16  }
  0x11   : > { %1308 = sst [smem:[#allocation8_spill]] %s1318_s17  ;;  %s43_s18 = sadd.s32 1, %s1023_s26 }
  0x12   : > { %p56_p9 = scmp.ne.s32.totalorder %s1019_s25, %s1015_s24  ;;  %s38_s19 = ssub.s32 %s1031_s28, %s1318_s17 }
  0x13   : > { %p1163_p10 = por %p51_p8, %p50_p7  ;;  %p41_p11 = scmp.eq.s32.totalorder %s38_s19, 0 }
  0x14   : > { %p1169_p12 = por %p1136_p1, %p56_p9  ;;  %s271_s22 = sand.u32 1, %s1023_s26  }
  0x15   : > { %s775_s23 = sshll.u32 %s1031_s28, 3  ;;  %p837_p13 = scmp.lt.s32.totalorder %s1035_s29, 2 }
  0x16   : > { %s1176_s30 = scalar_select %p41_p11, %s1023_s26, %s43_s18  }
  0x17   : > { %s774_s9 = sshll.u32 %s271_s22, 3  ;;  %s280_s11 = scalar_lea.hbm %s1295_s0, %s775_s23 }
  0x18   : > { %s282_s13 = sshll.u32 %s280_s11, 4  ;;  %s275_s14 = scalar_lea.vmem [#allocation2], %s774_s9  ;;  %s283_s13 = int_to_ptr.hbm [resolvable:$true] %s282_s13 }
  0x19   : > { %s284_s15 = sshll.u32 %s275_s14, 4  ;;  %p833_p0 = pnand %p837_p13, %p1163_p10  ;;  %s285_s15 = int_to_ptr.vmem [resolvable:$true] %s284_s15 }
  0x1a   : > { %s272_s16 = scalar_lea.sflag [#allocation3], %s271_s22  ;;  %293 = sbr.rel (%p1144_p3) target bundleno = 616 (0x268), region = 40 }
  0x1b   : > { %835 = dma.hbm_to_vmem [thread:$0]  (!%p833_p0), %s283_s13, 128, %s285_s15, %s272_s16  }
  0x1c   : > { %s295_s18 = sand.u32 (!%p1144_p3), 1, %s1019_s25  }
  0x1d   : > { %s777_s19 = sshll.u32 (!%p1144_p3), %s295_s18, 3  ;;  %s296_s1 = scalar_lea.sflag (!%p1144_p3), [#allocation3], %s295_s18 }
  0x1e   : > { %s299_s17 = scalar_lea.vmem (!%p1144_p3), [#allocation2], %s777_s19 }
  0x1f   : > { %1006 = dma.done.wait (%p1169_p12), %s296_s1, 128  }
  0x20   : > { %1008 = vsyncadd (%p1169_p12), %s296_s1, 4294967168 }
  0x21   : > { %1010 = dma.done.wait (%p1136_p1), [#allocation5], 256  }
  0x22   : > { %1012 = vsyncadd (%p1136_p1), [#allocation5], 4294967040  ;;  %vm381_vm0 = vcmask 261120   ;;  %v380_v0 = vld [vmem:[%s299_s17] sm:$0xff]  ;;  %v1040_v2 = vmov 32.0   ;;  %v821_v14 = vld [vmem:[#allocation4 + $0x8] sm:$0xff] }
  0x23   : > { %v382_v1 = vsel %vm381_vm0, %v380_v0, 0.0  ;;  %917 = vrcp.f32 %v1040_v2  ;;  %451 = vmatpush.bf16.msra.mxu0 %v821_v14  ;;  %v820_v15 = vld [vmem:[#allocation4] sm:$0xff]  ;;  %v914_v25 = vld [vmem:[%s1298_s3] ss:$0 sm:$0xff]  ;;  %p355_p1 = scmp.lt.s32.totalorder %s1027_s27, 1  ;;  %vm459_vm5 = vcmask 27648  }
  0x24   : > { %383 = vadd.xlane.f32.xlu0 %v382_v1  ;;  %v915_v28 = vld [vmem:[%s1299_s4] ss:$0 sm:$0xff]  ;;  %s1041_s24 = smov 60   ;;  %s1042_s11 = smov 124  }
  0x25   : > { %s1320_s27 = smov (!%p355_p1, %s1027_s27), 1  ;;  %v916_v32 = vld [vmem:[%s1297_s2] ss:$0 sm:$0xff]  ;;  %s1043_s13 = smov 96  }
  0x26   : > { %s1209_s22 = sshll.u32 %s1320_s27, 5  ;;  %s1044_s27 = smov 112  }
  0x27   : > { %452 = vmatpush.bf16.msra.mxu0 %v820_v15  ;;  %s1215_s10 = scalar_lea.vmem %s1300_s5, %s1209_s22  ;;  %s1045_s14 = smov 92  }
  0x28   : > { %s1046_s15 = smov 64   ;;  %s1047_s16 = smov 108  }
  0x29   : > { %v918_v3 = vpop.eup %917  ;;  %s1048_s18 = smov 88   ;;  %s1049_s19 = smov 120  }
  0x2a   : > { %v386_v4 = vmul.f32 32.0, %v918_v3  ;;  %vm390_vm1 = vweird.f32 %v918_v3  ;;  %s1050_s1 = smov 104   ;;  %s1051_s8 = smov 116  }
  0x2b   : > { %s1052_s12 = smov 56   ;;  %s1053_s17 = smov 100  }
  0x2c   : > { %v387_v5 = vsub.f32 1.0, %v386_v4  ;;  %s1054_s20 = smov 52   ;;  %s1055_s21 = smov 84  }
  0x2d   : > { %s1056_s23 = smov 48   ;;  %s1057_s9 = smov 80  }
  0x2e   : > { %v388_v6 = vmul.f32 %v918_v3, %v387_v5 }
  0x30   : > { %v389_v7 = vadd.f32 %v918_v3, %v388_v6 }
  0x32   : > { %v391_v8 = vsel %vm390_vm1, %v918_v3, %v389_v7 }
  0x97   : > { %v384_v9 = vpop.xlane.xlu0 %383 }
  0x98   : > { %v392_v10 = vmul.f32 %v391_v8, %v384_v9 }
  0x9a   : > { %v393_v11 = vsub.f32 %v380_v0, %v392_v10 }
  0x9c   : > { %v394_v12 = vmul.f32 %v393_v11, %v393_v11 }
  0x9e   : > { %v395_v13 = vsel %vm381_vm0, %v394_v12, 0.0 }
  0x9f   : > { %396 = vadd.xlane.f32.xlu0 %v395_v13 }
 0x112   : > { %v397_v16 = vpop.xlane.xlu0 %396 }
 0x113   : > { %v398_v17 = vmul.f32 %v397_v16, %v391_v8 }
 0x115   : > { %v399_v18 = vadd.f32 1e-05, %v398_v17 }
 0x117   : > { %919 = vrsqrt.f32 %v399_v18  ;;  %vm406_vm3 = vweird.f32 %v399_v18 }
 0x11d   : > { %v920_v19 = vpop.eup %919 }
 0x11e   : > { %v401_v20 = vmul.f32 %v920_v19, %v399_v18  ;;  %vm407_vm2 = vweird.f32 %v920_v19 }
 0x11f   : > { %vm408_vm4 = vmor %vm406_vm3, %vm407_vm2 }
 0x120   : > { %v402_v21 = vmul.f32 %v920_v19, %v401_v20 }
 0x122   : > { %v403_v22 = vmul.f32 0.5, %v402_v21 }
 0x124   : > { %v404_v23 = vsub.f32 1.5, %v403_v22 }
 0x126   : > { %v405_v24 = vmul.f32 %v920_v19, %v404_v23 }
 0x128   : > { %v409_v26 = vsel %vm408_vm4, %v920_v19, %v405_v24 }
 0x129   : > { %v410_v27 = vmul.f32 %v409_v26, %v393_v11 }
 0x12b   : > { %v415_v29 = vmul.f32 %v914_v25, %v410_v27 }
 0x12d   : > { %v420_v30 = vadd.f32 %v915_v28, %v415_v29 }
 0x12f   : > { %v421_v31 = vpack.c.bf16 %v420_v30, %v420_v30 }
 0x131   : > { %793 = vmatmul.msk.bf16.vlgmr.msra.gmra.mxu0 %vm381_vm0, %v421_v31 }
 0x1ae   : > { %v454_v33 = vpop.f32.mrf.mxu0 }
 0x1af   : > { %v455_v34 = vadd.f32 %v916_v32, %v454_v33 }
 0x1b1   : > { %v458_v35 = vpack.c.bf16 %v455_v34, %v455_v34 }
 0x1b3   : > { %480 = vrot.lane.b32.xlu0 %v458_v35, %s1041_s24  ;;  %470 = vrot.lane.b32.xlu2 %v458_v35, %s1042_s11  ;;  %460 = vst.msk [vmem:[%s1215_s10] sm:$0xf] %vm459_vm5, %v458_v35  ;;  %s1058_s24 = smov 44   ;;  %s1059_s11 = smov 76  }
 0x1b4   : > { %462 = vrot.lane.b32.xlu1 %v458_v35, %s1043_s13  ;;  %s1060_s13 = smov 40  }
 0x1b6   : > { %v456_v36 = vpop.f32.mrf.mxu0 }
 0x1bb   : > { %515 = vrot.lane.b32.xlu0 %v458_v35, %s1044_s27  ;;  %475 = vrot.lane.b32.xlu2 %v458_v35, %s1045_s14  ;;  %s1061_s27 = smov 72   ;;  %s1062_s14 = smov 36  }
 0x1bc   : > { %466 = vrot.lane.b32.xlu1 %v458_v35, %s1046_s15  ;;  %s1063_s15 = smov 68  }
 0x1c3   : > { %530 = vrot.lane.b32.xlu0 %v458_v35, %s1047_s16  ;;  %490 = vrot.lane.b32.xlu2 %v458_v35, %s1048_s18 }
 0x1c4   : > { %485 = vrot.lane.b32.xlu1 %v458_v35, %s1049_s19  ;;  %s1225_s19 = scalar_lea.vmem %s1301_s6, %s1209_s22 }
 0x1cb   : > { %545 = vrot.lane.b32.xlu0 %v458_v35, %s1050_s1  ;;  %500 = vrot.lane.b32.xlu2 %v458_v35, %s1051_s8 }
 0x1cc   : > { %495 = vrot.lane.b32.xlu1 %v458_v35, %s1052_s12  ;;  %s1235_s12 = scalar_lea.vmem %s1302_s7, %s1209_s22 }
 0x1d3   : > { %560 = vrot.lane.b32.xlu0 %v458_v35, %s1053_s17  ;;  %510 = vrot.lane.b32.xlu2 %v458_v35, %s1054_s20 }
 0x1d4   : > { %505 = vrot.lane.b32.xlu1 %v458_v35, %s1055_s21 }
 0x1db   : > { %525 = vrot.lane.b32.xlu2 %v458_v35, %s1056_s23 }
 0x1dc   : > { %520 = vrot.lane.b32.xlu1 %v458_v35, %s1057_s9 }
 0x1e3   : > { %540 = vrot.lane.b32.xlu2 %v458_v35, %s1058_s24 }
 0x1e4   : > { %535 = vrot.lane.b32.xlu1 %v458_v35, %s1059_s11 }
 0x1eb   : > { %555 = vrot.lane.b32.xlu2 %v458_v35, %s1060_s13 }
 0x1ec   : > { %550 = vrot.lane.b32.xlu1 %v458_v35, %s1061_s27 }
 0x1f3   : > { %570 = vrot.lane.b32.xlu2 %v458_v35, %s1062_s14 }
 0x1f4   : > { %565 = vrot.lane.b32.xlu1 %v458_v35, %s1063_s15 }
 0x20d   : > { %v471_v37 = vpop.permute.xlu2 %470 }
 0x20e   : > { %794 = vst.msk [vmem:[%s1215_s10 + $0x4] sm:$0xf] %vm459_vm5, %v471_v37 }
 0x215   : > { %v476_v38 = vpop.permute.xlu2 %475 }
 0x216   : > { %795 = vst.msk [vmem:[%s1225_s19 + $0x4] sm:$0xf] %vm459_vm5, %v476_v38 }
 0x21d   : > { %v491_v39 = vpop.permute.xlu2 %490 }
 0x21e   : > { %798 = vst.msk [vmem:[%s1225_s19 + $0x8] sm:$0xf] %vm459_vm5, %v491_v39 }
 0x225   : > { %v481_v40 = vpop.permute.xlu0 %480  ;;  %v501_v41 = vpop.permute.xlu2 %500 }
 0x226   : > { %796 = vst.msk [vmem:[%s1235_s12 + $0x4] sm:$0xf] %vm459_vm5, %v481_v40  ;;  %v463_v42 = vpop.permute.xlu1 %462 }
 0x227   : > { %800 = vst.msk [vmem:[%s1215_s10 + $0xc] sm:$0xf] %vm459_vm5, %v501_v41 }
 0x228   : > { %465 = vst.msk [vmem:[%s1225_s19] sm:$0xf] %vm459_vm5, %v463_v42 }
 0x22d   : > { %v516_v43 = vpop.permute.xlu0 %515  ;;  %v511_v44 = vpop.permute.xlu2 %510 }
 0x22e   : > { %803 = vst.msk [vmem:[%s1215_s10 + $0x10] sm:$0xf] %vm459_vm5, %v516_v43  ;;  %v467_v45 = vpop.permute.xlu1 %466 }
 0x22f   : > { %802 = vst.msk [vmem:[%s1235_s12 + $0xc] sm:$0xf] %vm459_vm5, %v511_v44 }
 0x230   : > { %469 = vst.msk [vmem:[%s1235_s12] sm:$0xf] %vm459_vm5, %v467_v45 }
 0x235   : > { %v531_v46 = vpop.permute.xlu0 %530  ;;  %v526_v47 = vpop.permute.xlu2 %525 }
 0x236   : > { %806 = vst.msk [vmem:[%s1215_s10 + $0x14] sm:$0xf] %vm459_vm5, %v531_v46  ;;  %v486_v48 = vpop.permute.xlu1 %485 }
 0x237   : > { %805 = vst.msk [vmem:[%s1235_s12 + $0x10] sm:$0xf] %vm459_vm5, %v526_v47 }
 0x238   : > { %797 = vst.msk [vmem:[%s1215_s10 + $0x8] sm:$0xf] %vm459_vm5, %v486_v48 }
 0x23d   : > { %v546_v49 = vpop.permute.xlu0 %545  ;;  %v541_v50 = vpop.permute.xlu2 %540 }
 0x23e   : > { %809 = vst.msk [vmem:[%s1215_s10 + $0x18] sm:$0xf] %vm459_vm5, %v546_v49  ;;  %v496_v51 = vpop.permute.xlu1 %495 }
 0x23f   : > { %808 = vst.msk [vmem:[%s1235_s12 + $0x14] sm:$0xf] %vm459_vm5, %v541_v50 }
 0x240   : > { %799 = vst.msk [vmem:[%s1235_s12 + $0x8] sm:$0xf] %vm459_vm5, %v496_v51 }
 0x245   : > { %v561_v52 = vpop.permute.xlu0 %560  ;;  %v556_v53 = vpop.permute.xlu2 %555 }
 0x246   : > { %812 = vst.msk [vmem:[%s1215_s10 + $0x1c] sm:$0xf] %vm459_vm5, %v561_v52  ;;  %v506_v54 = vpop.permute.xlu1 %505 }
 0x247   : > { %811 = vst.msk [vmem:[%s1235_s12 + $0x18] sm:$0xf] %vm459_vm5, %v556_v53 }
 0x248   : > { %801 = vst.msk [vmem:[%s1225_s19 + $0xc] sm:$0xf] %vm459_vm5, %v506_v54 }
 0x24d   : > { %v571_v55 = vpop.permute.xlu2 %570 }
 0x24e   : > { %814 = vst.msk [vmem:[%s1235_s12 + $0x1c] sm:$0xf] %vm459_vm5, %v571_v55  ;;  %v521_v56 = vpop.permute.xlu1 %520 }
 0x24f   : > { %804 = vst.msk [vmem:[%s1225_s19 + $0x10] sm:$0xf] %vm459_vm5, %v521_v56 }
 0x256   : > { %v536_v57 = vpop.permute.xlu1 %535 }
 0x257   : > { %807 = vst.msk [vmem:[%s1225_s19 + $0x14] sm:$0xf] %vm459_vm5, %v536_v57 }
 0x25e   : > { %v551_v58 = vpop.permute.xlu1 %550 }
 0x25f   : > { %810 = vst.msk [vmem:[%s1225_s19 + $0x18] sm:$0xf] %vm459_vm5, %v551_v58 }
 0x266   : > { %v566_v59 = vpop.permute.xlu1 %565 }
 0x267   : > { %813 = vst.msk [vmem:[%s1225_s19 + $0x1c] sm:$0xf] %vm459_vm5, %v566_v59 }
 0x268 PF: > { %s22_s29 = sadd.s32 1, %s1035_s29   ;;  %s1311_s22 = sld [smem:[#allocation8_spill]] }
 0x269   : > { %p19_p2 = scmp.ge.s32.totalorder %s22_s29, 4   ;;  %s1312_s24 = smov %s1019_s25 }
 0x26a   : > { %s1313_s25 = smov %s1023_s26  ;;  %s1314_s26 = smov %s1176_s30 }
 0x26b   : > { %s1315_s27 = smov %s1031_s28  ;;  %21 = sbr.rel (!%p19_p2) target bundleno = 7 (0x7), region = 129 }
 0x26e   : > { %s1316_s28 = smov %s1311_s22 }
 0x270   :  { %646 = vsyncpa [#allocation3], 1 }
 0x271   :  { %648 = vsyncpa [#allocation3 + $0x1], 1 }
 0x272   :  { %649 = vsyncpa [#allocation5], 1 }

</bundles_post_ra>
